<compile_context>
chip_gen: v7x
topology: tpu7x:2x2x1
jax: 0.10.0
libtpu: 0.0.40
codegen_flags: <defaults>
</compile_context>

<pallas_src>
import functools
import math

import jax
import jax.numpy as jnp
from jax.experimental import pallas as pl
from jax.experimental.pallas import tpu as pltpu


# ------------------------------ small helpers -------------------------------

def _round_up(a, m):
    return -(-a // m) * m


def _device_kind():
    try:
        return jax.devices()[0].device_kind.lower()
    except Exception:
        return ""


def _vmem_capacity_bytes():
    try:
        return int(pltpu.get_tpu_info().vmem_capacity_bytes)
    except Exception:
        # v7x TensorCores have 64 MiB of VMEM; earlier generations 128 MiB.
        return (64 << 20) if "v7" in _device_kind() else (128 << 20)


def _gelu_tanh(x):
    # tanh-approx GELU -> the transcendental lands in the EUP slot.
    # TODO(synk): torch.nn.GELU() defaults to the exact-erf variant; the tanh
    # approximation differs by <~1e-3 abs, below bf16 matmul noise.
    c = math.sqrt(2.0 / math.pi)
    return 0.5 * x * (1.0 + jnp.tanh(c * (x + 0.044715 * x * x * x)))


# ----------------------------- Pallas kernel --------------------------------

def _moe_mlp_kernel(counts_ref,                                   # SMEM (prefetch)
                    x_ref, w1_ref, b1_ref, w2_ref, b2_ref, gate_ref,
                    o_ref, *, resident, bf16_act):
    t = pl.program_id(0)               # token tile
    e = pl.program_id(1)               # expert (innermost, accumulated)
    n_e = pl.num_programs(1)

    @pl.when(e == 0)
    def _init():
        # o_ref's block index is constant across the expert axis, so it stays
        # VMEM-resident over the reduction and is written back once per tile.
        o_ref[...] = jnp.zeros_like(o_ref)

    # Skip (token-tile, expert) pairs that route zero tokens to this expert
    # (saves MXU work only; weight DMA is avoided structurally via residency).
    @pl.when(counts_ref[t * n_e + e] > 0)
    def _compute():
        if resident:
            w1, b1 = w1_ref[e], b1_ref[e]       # (D, H) bf16, (1, H) f32
            w2, b2 = w2_ref[e], b2_ref[e]       # (H, Dout) bf16, (1, Dout) f32
        else:
            w1, b1 = w1_ref[...], b1_ref[...]
            w2, b2 = w2_ref[...], b2_ref[...]

        x = x_ref[...]                                            # (TM, D) bf16
        h = jnp.dot(x, w1, preferred_element_type=jnp.float32) + b1
        if bf16_act:
            # bf16 VALU/EUP path (v6e/v7x): halves VPU pressure on the GELU.
            h = _gelu_tanh(h.astype(jnp.bfloat16))
        else:
            h = _gelu_tanh(h).astype(jnp.bfloat16)
        # drop1 / drop2 are nn.Dropout(0.0) -> identity.
        y = jnp.dot(h, w2, preferred_element_type=jnp.float32) + b2

        # Top-1 gate: router prob for the chosen expert, 0 otherwise. Gate is
        # stored lane-dense (E, TM); the tiny (1, TM) -> (TM, 1) transpose
        # runs on the XLU which has slack under the MXU.
        g = jnp.transpose(gate_ref[pl.ds(e, 1), :])               # (TM, 1) f32
        o_ref[...] += y * g


# ------------------------- tiling / residency planner -----------------------

def _plan(T, D, H, Dout, E, tm_req):
    """Pick token-tile size, weight-residency strategy and the VMEM limit."""
    cap = _vmem_capacity_bytes()
    # Leave headroom for compiler-internal scratch: ~110 MiB budget on 128-MiB
    # parts (v5e/v6e), ~56 MiB on 64-MiB v7x.
    limit_cap = max(min(cap - (8 << 20), 110 << 20), 32 << 20)

    if T <= tm_req:
        tm = max(8, _round_up(T, 8))              # single tile covers all tokens
    else:
        tm = max(128, (tm_req // 128) * 128)      # lane/sublane-aligned tiles

    def weight_bytes(resident):
        copies = E if resident else 2             # resident: all experts, once;
                                                  # streaming: 1 expert, 2 bufs
        return copies * ((D * H + H * Dout) * 2          # bf16 matmul weights
                         + 8 * (H + Dout) * 4)           # f32 biases (padded)

    def act_bytes(tm_):
        e_pad = _round_up(max(E, 8), 8)
        return (2 * tm_ * D * 2            # x tile (bf16, double-buffered)
                + 2 * tm_ * Dout * 4       # output tile (f32, double-buffered)
                + 2 * e_pad * tm_ * 4      # gate tile (f32, double-buffered)
                + tm_ * H * 4              # fc1 activation (f32)
                + tm_ * H * 2              # bf16 activation for 2nd matmul
                + tm_ * Dout * 4)          # expert output before accumulation

    def est(tm_, resident):
        return int(1.4 * (weight_bytes(resident) + act_bytes(tm_))) + (6 << 20)

    # Shrink the tile until at least the streaming variant fits.
    while est(tm, False) > limit_cap and tm > 128:
        tm = max(128, (tm // 2) // 128 * 128)

    resident = est(tm, True) <= limit_cap
    vmem_limit = max(min(est(tm, resident), limit_cap), 32 << 20)

    kind = _device_kind()
    bf16_act = ("v6" in kind) or ("v7" in kind)   # no bf16 VPU/EUP before v6
    return tm, resident, bf16_act, vmem_limit


def _resident_spec(shape):
    index_map = lambda t, e, c: (0,) * len(shape)
    try:
        # Constant block index + single buffer: DMA'd from HBM exactly once and
        # VMEM-resident for the whole grid.
        return pl.BlockSpec(shape, index_map, pipeline_mode=pl.Buffered(1))
    except TypeError:   # pipeline_mode not available -> default double-buffer
        return pl.BlockSpec(shape, index_map)


def moe_expert_mlp(x_tokens, w1, b1, w2, b2, gate, counts, *, tm, resident,
                   bf16_act, vmem_limit):
    """x_tokens: (Tp, D) bf16, w1: (E, D, H) bf16, b1: (E, 1, H) f32,
       w2: (E, H, Dout) bf16, b2: (E, 1, Dout) f32, gate: (E, Tp) f32,
       counts: (Tp//tm * E,) int32 routed-token counts per (tile, expert)."""
    Tp, D = x_tokens.shape
    E, _, H = w1.shape
    Dout = w2.shape[-1]
    n_tiles = Tp // tm

    if resident:
        weight_specs = [_resident_spec((E, D, H)),
                        _resident_spec((E, 1, H)),
                        _resident_spec((E, H, Dout)),
                        _resident_spec((E, 1, Dout))]
    else:
        weight_specs = [pl.BlockSpec((None, D, H), lambda t, e, c: (e, 0, 0)),
                        pl.BlockSpec((None, 1, H), lambda t, e, c: (e, 0, 0)),
                        pl.BlockSpec((None, H, Dout), lambda t, e, c: (e, 0, 0)),
                        pl.BlockSpec((None, 1, Dout), lambda t, e, c: (e, 0, 0))]

    kernel = functools.partial(_moe_mlp_kernel, resident=resident,
                               bf16_act=bf16_act)

    return pl.pallas_call(
        kernel,
        out_shape=jax.ShapeDtypeStruct((Tp, Dout), jnp.float32),
        grid_spec=pltpu.PrefetchScalarGridSpec(
            num_scalar_prefetch=1,
            grid=(n_tiles, E),
            in_specs=([pl.BlockSpec((tm, D), lambda t, e, c: (t, 0))]   # x tile
                      + weight_specs
                      + [pl.BlockSpec((E, tm), lambda t, e, c: (0, t))]),  # gate
            out_specs=pl.BlockSpec((tm, Dout), lambda t, e, c: (t, 0)),
        ),
        compiler_params=pltpu.CompilerParams(
            dimension_semantics=("parallel", "arbitrary"),
            vmem_limit_bytes=vmem_limit),
    )(counts, x_tokens, w1, b1, w2, b2, gate)


# ------------------------------- JAX glue -----------------------------------

def router_z_loss_func(router_logits):
    log_z = jax.scipy.special.logsumexp(router_logits, axis=-1)
    return jnp.mean(log_z ** 2)


def load_balancing_loss_func(router_probs, expert_indices):
    num_experts = router_probs.shape[-1]
    expert_mask = jax.nn.one_hot(expert_indices, num_experts, dtype=jnp.float32)
    tokens_per_expert = jnp.mean(expert_mask, axis=-2)
    router_prob_per_expert = jnp.mean(router_probs, axis=-2)
    return jnp.mean(tokens_per_expert * router_prob_per_expert) * (num_experts ** 2)


def mlp_withmoe_forward(params, x, attr=None, *, attr_len, is_scale_prob=True,
                        tm=512):
    """Forward of Mlp_withmoe (eval mode, drop=0.0)."""
    B, N, D = x.shape

    # Router-input selection mirrors Mlp_withmoe.forward.
    if attr is not None and attr_len > D:
        router_in = jnp.concatenate([x, attr], axis=-1)
    elif attr is not None:
        router_in = attr
    else:
        router_in = x

    # TODO(synk): TaskMoE's multiplicative router_noise and capacity-based
    # token dropping are training-time behaviors; eval (no-noise, no-drop)
    # top-1 switch routing implemented here.
    router_logits = router_in @ params["wr"] + params["br"]          # [B,N,E]
    router_probs = jax.nn.softmax(router_logits, axis=-1)
    expert_index = jnp.argmax(router_probs, axis=-1)                 # [B,N]
    E = router_probs.shape[-1]

    onehot = jax.nn.one_hot(expert_index, E, dtype=jnp.float32)
    if is_scale_prob:
        gate = onehot * router_probs      # scale expert output by its prob
    else:
        gate = onehot                     # prob / prob.detach() == 1 in value
        # TODO(synk): straight-through gradient of is_scale_prob=False dropped
        # (eval-only scope).

    # ---- token-tile planning / padding / layout for the kernel ----
    T = B * N
    H = params["w1"].shape[-1]
    Dout = params["w2"].shape[-1]
    tm_eff, resident, bf16_act, vmem_limit = _plan(T, D, H, Dout, E, tm)

    Tp = _round_up(T, tm_eff)
    pad = Tp - T
    n_tiles = Tp // tm_eff

    x_tok = jnp.pad(x.reshape(T, D), ((0, pad), (0, 0))).astype(jnp.bfloat16)
    gate_tok = jnp.pad(gate.reshape(T, E), ((0, pad), (0, 0)))       # [Tp, E]
    gate_e = gate_tok.T                                              # [E, Tp]

    # Routed-token counts per (token tile, expert) -> SMEM scalar prefetch.
    onehot_tok = jnp.pad(onehot.reshape(T, E), ((0, pad), (0, 0)))
    counts = onehot_tok.reshape(n_tiles, tm_eff, E).sum(axis=1)
    counts = counts.astype(jnp.int32).reshape(-1)                    # [n_tiles*E]

    # bf16 operands for the MXU; biases stay f32 (added post-accumulation).
    w1 = params["w1"].astype(jnp.bfloat16)
    w2 = params["w2"].astype(jnp.bfloat16)

    y = moe_expert_mlp(x_tok, w1, params["b1"], w2, params["b2"],
                       gate_e, counts, tm=tm_eff, resident=resident,
                       bf16_act=bf16_act, vmem_limit=vmem_limit)
    y = y[:T].reshape(B, N, Dout)

    z_loss = router_z_loss_func(router_logits)
    balance_loss = load_balancing_loss_func(router_probs, expert_index)
    return y, z_loss, balance_loss


def init_params(key, in_features, hidden_features, out_features,
                attr_hidden_size, num_experts):
    ks = jax.random.split(key, 6)
    s1 = 1.0 / math.sqrt(in_features)
    s2 = 1.0 / math.sqrt(hidden_features)
    sr = 1.0 / math.sqrt(attr_hidden_size)
    u = jax.random.uniform
    return dict(
        w1=u(ks[0], (num_experts, in_features, hidden_features), jnp.float32, -s1, s1),
        b1=u(ks[1], (num_experts, 1, hidden_features), jnp.float32, -s1, s1),
        w2=u(ks[2], (num_experts, hidden_features, out_features), jnp.float32, -s2, s2),
        b2=u(ks[3], (num_experts, 1, out_features), jnp.float32, -s2, s2),
        wr=u(ks[4], (attr_hidden_size, num_experts), jnp.float32, -sr, sr),
        br=u(ks[5], (num_experts,), jnp.float32, -sr, sr),
    )


def _reference_forward(params, x, attr, attr_len, is_scale_prob):
    """Pure-JAX f32 reference of the routed-MLP math (tanh GELU)."""
    B, N, D = x.shape
    if attr is not None and attr_len > D:
        router_in = jnp.concatenate([x, attr], axis=-1)
    elif attr is not None:
        router_in = attr
    else:
        router_in = x
    logits = router_in @ params["wr"] + params["br"]
    probs = jax.nn.softmax(logits, axis=-1)
    idx = jnp.argmax(probs, axis=-1)
    E = probs.shape[-1]
    onehot = jax.nn.one_hot(idx, E, dtype=jnp.float32)
    gate = onehot * probs if is_scale_prob else onehot
    x_t = x.reshape(-1, D)
    ys = []
    for e in range(E):
        h = _gelu_tanh(x_t @ params["w1"][e] + params["b1"][e])
        ys.append(h @ params["w2"][e] + params["b2"][e])
    y_all = jnp.stack(ys, axis=0)                         # (E, T, Dout)
    g = gate.reshape(-1, E).T[:, :, None]                 # (E, T, 1)
    return (y_all * g).sum(axis=0).reshape(B, N, -1)


if __name__ == "__main__":
    B, N = 2, 8
    in_features = 32
    hidden_features = 64
    out_features = 32
    attr_len = 16          # attr_len <= in_features -> router input is `attr`
    num_experts = 4

    key = jax.random.PRNGKey(0)
    k_x, k_a, k_p = jax.random.split(key, 3)
    x = jax.random.normal(k_x, (B, N, in_features), jnp.float32)
    attr = jax.random.normal(k_a, (B, N, attr_len), jnp.float32)

    params = init_params(k_p, in_features, hidden_features, out_features,
                         attr_hidden_size=attr_len, num_experts=num_experts)

    out, z_loss, balance_loss = mlp_withmoe_forward(
        params, x, attr, attr_len=attr_len, is_scale_prob=True)
    jax.block_until_ready((out, z_loss, balance_loss))

    assert out.shape == (B, N, out_features)
    assert z_loss.shape == () and balance_loss.shape == ()
    assert bool(jnp.all(jnp.isfinite(out)))

    # Loose check vs. a pure-JAX f32 reference (kernel uses bf16 operands).
    ref = _reference_forward(params, x, attr, attr_len, True)
    max_err = float(jnp.max(jnp.abs(out - ref)))
    assert max_err < 5e-2, f"max abs error {max_err}"

    print("KERNEL_OK")
</pallas_src>

<mosaic_0001>
module attributes {stable_mosaic.version = 11 : i64} {
  func.func @_moe_mlp_kernel(%arg0: i32, %arg1: i32, %arg2: memref<4xi32, #tpu.memory_space<smem>>, %arg3: memref<16x32xbf16, #tpu.memory_space<vmem>>, %arg4: memref<4x32x64xbf16, #tpu.memory_space<vmem>>, %arg5: memref<4x1x64xf32, #tpu.memory_space<vmem>>, %arg6: memref<4x64x32xbf16, #tpu.memory_space<vmem>>, %arg7: memref<4x1x32xf32, #tpu.memory_space<vmem>>, %arg8: memref<4x16xf32, #tpu.memory_space<vmem>>, %arg9: memref<16x32xf32, #tpu.memory_space<vmem>>) attributes {dimension_semantics = [#tpu.dimension_semantics<parallel>, #tpu.dimension_semantics<arbitrary>], iteration_bounds = array<i64: 1, 4>, scalar_prefetch = 1 : i64, scratch_operands = 0 : i64, tpu.core_type = #tpu.core_type<tc>, window_params = [{transform_indices = @transform_0, window_bounds = array<i64: 16, 32>}, {pipeline_mode = #tpu.pipeline_mode<synchronous>, transform_indices = @transform_1, window_bounds = array<i64: 4, 32, 64>}, {pipeline_mode = #tpu.pipeline_mode<synchronous>, transform_indices = @transform_2, window_bounds = array<i64: 4, 1, 64>}, {pipeline_mode = #tpu.pipeline_mode<synchronous>, transform_indices = @transform_3, window_bounds = array<i64: 4, 64, 32>}, {pipeline_mode = #tpu.pipeline_mode<synchronous>, transform_indices = @transform_4, window_bounds = array<i64: 4, 1, 32>}, {transform_indices = @transform_5, window_bounds = array<i64: 4, 16>}, {transform_indices = @transform_6, window_bounds = array<i64: 16, 32>}]} {
    %c0_i32 = arith.constant 0 : i32
    %0 = arith.cmpi eq, %arg1, %c0_i32 : i32
    %1 = arith.extui %0 : i1 to i32
    %c0_i32_0 = arith.constant 0 : i32
    %2 = arith.cmpi ne, %1, %c0_i32_0 : i32
    scf.if %2 {
      %cst = arith.constant 0.000000e+00 : f32
      %10 = vector.broadcast %cst : f32 to vector<16x32xf32>
      %c0 = arith.constant 0 : index
      %c0_3 = arith.constant 0 : index
      %11 = vector.load %arg9[%c0, %c0_3] : memref<16x32xf32, #tpu.memory_space<vmem>>, vector<16x32xf32>
      tpu.vector_store %arg9[%c0, %c0_3], %10 {strides = array<i32>} : memref<16x32xf32, #tpu.memory_space<vmem>>, vector<16x32xf32>,
    } else {
    }
    %c4_i32 = arith.constant 4 : i32
    %3 = arith.muli %arg0, %c4_i32 : i32
    %4 = arith.addi %3, %arg1 : i32
    %5 = arith.index_cast %4 : i32 to index
    %6 = memref.load %arg2[%5] : memref<4xi32, #tpu.memory_space<smem>>
    %c0_i32_1 = arith.constant 0 : i32
    %7 = arith.cmpi sgt, %6, %c0_i32_1 : i32
    %8 = arith.extui %7 : i1 to i32
    %c0_i32_2 = arith.constant 0 : i32
    %9 = arith.cmpi ne, %8, %c0_i32_2 : i32
    scf.if %9 {
      %10 = arith.index_cast %arg1 : i32 to index
      %c0 = arith.constant 0 : index
      %c0_3 = arith.constant 0 : index
      %11 = vector.load %arg4[%10, %c0, %c0_3] : memref<4x32x64xbf16, #tpu.memory_space<vmem>>, vector<1x32x64xbf16>
      %12 = vector.shape_cast %11 : vector<1x32x64xbf16> to vector<32x64xbf16>
      %13 = arith.index_cast %arg1 : i32 to index
      %c0_4 = arith.constant 0 : index
      %c0_5 = arith.constant 0 : index
      %14 = vector.load %arg5[%13, %c0_4, %c0_5] : memref<4x1x64xf32, #tpu.memory_space<vmem>>, vector<1x1x64xf32>
      %15 = vector.shape_cast %14 : vector<1x1x64xf32> to vector<1x64xf32>
      %16 = arith.index_cast %arg1 : i32 to index
      %c0_6 = arith.constant 0 : index
      %c0_7 = arith.constant 0 : index
      %17 = vector.load %arg6[%16, %c0_6, %c0_7] : memref<4x64x32xbf16, #tpu.memory_space<vmem>>, vector<1x64x32xbf16>
      %18 = vector.shape_cast %17 : vector<1x64x32xbf16> to vector<64x32xbf16>
      %19 = arith.index_cast %arg1 : i32 to index
      %c0_8 = arith.constant 0 : index
      %c0_9 = arith.constant 0 : index
      %20 = vector.load %arg7[%19, %c0_8, %c0_9] : memref<4x1x32xf32, #tpu.memory_space<vmem>>, vector<1x1x32xf32>
      %21 = vector.shape_cast %20 : vector<1x1x32xf32> to vector<1x32xf32>
      %c0_10 = arith.constant 0 : index
      %c0_11 = arith.constant 0 : index
      %22 = vector.load %arg3[%c0_10, %c0_11] : memref<16x32xbf16, #tpu.memory_space<vmem>>, vector<16x32xbf16>
      %cst = arith.constant dense<0.000000e+00> : vector<16x64xf32>
      %23 = tpu.matmul %22, %12, %cst {dimension_numbers = #tpu.dot_dimension_numbers<[1], [0], [0], [1], [0, 0, 1, 1], [], []>} : vector<16x32xbf16>, vector<32x64xbf16>, vector<16x64xf32> -> vector<16x64xf32>
      %24 = vector.broadcast %15 : vector<1x64xf32> to vector<16x64xf32>
      %25 = arith.addf %23, %24 : vector<16x64xf32>
      %cst_12 = arith.constant 5.000000e-01 : f32
      %26 = vector.broadcast %cst_12 : f32 to vector<16x64xf32>
      %27 = arith.mulf %26, %25 : vector<16x64xf32>
      %cst_13 = arith.constant 4.471500e-02 : f32
      %28 = vector.broadcast %cst_13 : f32 to vector<16x64xf32>
      %29 = arith.mulf %28, %25 : vector<16x64xf32>
      %30 = arith.mulf %29, %25 : vector<16x64xf32>
      %31 = arith.mulf %30, %25 : vector<16x64xf32>
      %32 = arith.addf %25, %31 : vector<16x64xf32>
      %cst_14 = arith.constant 0.797884583 : f32
      %33 = vector.broadcast %cst_14 : f32 to vector<16x64xf32>
      %34 = arith.mulf %33, %32 : vector<16x64xf32>
      %35 = math.tanh %34 : vector<16x64xf32>
      %cst_15 = arith.constant 1.000000e+00 : f32
      %36 = vector.broadcast %cst_15 : f32 to vector<16x64xf32>
      %37 = arith.addf %36, %35 : vector<16x64xf32>
      %38 = arith.mulf %27, %37 : vector<16x64xf32>
      %39 = arith.truncf %38 : vector<16x64xf32> to vector<16x64xbf16>
      %cst_16 = arith.constant dense<0.000000e+00> : vector<16x32xf32>
      %40 = tpu.matmul %39, %18, %cst_16 {dimension_numbers = #tpu.dot_dimension_numbers<[1], [0], [0], [1], [0, 0, 1, 1], [], []>} : vector<16x64xbf16>, vector<64x32xbf16>, vector<16x32xf32> -> vector<16x32xf32>
      %41 = vector.broadcast %21 : vector<1x32xf32> to vector<16x32xf32>
      %42 = arith.addf %40, %41 : vector<16x32xf32>
      %43 = arith.index_cast %arg1 : i32 to index
      %c0_17 = arith.constant 0 : index
      %44 = vector.load %arg8[%43, %c0_17] : memref<4x16xf32, #tpu.memory_space<vmem>>, vector<1x16xf32>
      %45 = tpu.transpose %44, [1, 0] : vector<1x16xf32> -> vector<16x1xf32>
      %c0_18 = arith.constant 0 : index
      %c0_19 = arith.constant 0 : index
      %46 = vector.load %arg9[%c0_18, %c0_19] : memref<16x32xf32, #tpu.memory_space<vmem>>, vector<16x32xf32>
      %47 = vector.broadcast %45 : vector<16x1xf32> to vector<16x32xf32>
      %48 = arith.mulf %42, %47 : vector<16x32xf32>
      %49 = arith.addf %46, %48 : vector<16x32xf32>
      %c0_20 = arith.constant 0 : index
      %c0_21 = arith.constant 0 : index
      %50 = vector.load %arg9[%c0_20, %c0_21] : memref<16x32xf32, #tpu.memory_space<vmem>>, vector<16x32xf32>
      tpu.vector_store %arg9[%c0_20, %c0_21], %49 {strides = array<i32>} : memref<16x32xf32, #tpu.memory_space<vmem>>, vector<16x32xf32>,
    } else {
    }
    return
  }
  func.func @transform_0(%arg0: i32, %arg1: i32, %arg2: memref<4xi32, #tpu.memory_space<smem>>) -> (i32, i32) {
    %c0_i32 = arith.constant 0 : i32
    %c0_i32_0 = arith.constant 0 : i32
    return %arg0, %c0_i32 : i32, i32
  }
  func.func @transform_1(%arg0: i32, %arg1: i32, %arg2: memref<4xi32, #tpu.memory_space<smem>>) -> (i32, i32, i32) {
    %c0_i32 = arith.constant 0 : i32
    %c0_i32_0 = arith.constant 0 : i32
    %c0_i32_1 = arith.constant 0 : i32
    %c0_i32_2 = arith.constant 0 : i32
    return %c0_i32, %c0_i32_0, %c0_i32_1 : i32, i32, i32
  }
  func.func @transform_2(%arg0: i32, %arg1: i32, %arg2: memref<4xi32, #tpu.memory_space<smem>>) -> (i32, i32, i32) {
    %c0_i32 = arith.constant 0 : i32
    %c0_i32_0 = arith.constant 0 : i32
    %c0_i32_1 = arith.constant 0 : i32
    %c0_i32_2 = arith.constant 0 : i32
    return %c0_i32, %c0_i32_0, %c0_i32_1 : i32, i32, i32
  }
  func.func @transform_3(%arg0: i32, %arg1: i32, %arg2: memref<4xi32, #tpu.memory_space<smem>>) -> (i32, i32, i32) {
    %c0_i32 = arith.constant 0 : i32
    %c0_i32_0 = arith.constant 0 : i32
    %c0_i32_1 = arith.constant 0 : i32
    %c0_i32_2 = arith.constant 0 : i32
    return %c0_i32, %c0_i32_0, %c0_i32_1 : i32, i32, i32
  }
  func.func @transform_4(%arg0: i32, %arg1: i32, %arg2: memref<4xi32, #tpu.memory_space<smem>>) -> (i32, i32, i32) {
    %c0_i32 = arith.constant 0 : i32
    %c0_i32_0 = arith.constant 0 : i32
    %c0_i32_1 = arith.constant 0 : i32
    %c0_i32_2 = arith.constant 0 : i32
    return %c0_i32, %c0_i32_0, %c0_i32_1 : i32, i32, i32
  }
  func.func @transform_5(%arg0: i32, %arg1: i32, %arg2: memref<4xi32, #tpu.memory_space<smem>>) -> (i32, i32) {
    %c0_i32 = arith.constant 0 : i32
    %c0_i32_0 = arith.constant 0 : i32
    return %c0_i32, %arg0 : i32, i32
  }
  func.func @transform_6(%arg0: i32, %arg1: i32, %arg2: memref<4xi32, #tpu.memory_space<smem>>) -> (i32, i32) {
    %c0_i32 = arith.constant 0 : i32
    %c0_i32_0 = arith.constant 0 : i32
    return %arg0, %c0_i32 : i32, i32
  }
}

</mosaic_0001>

<bundles_post_ra>
// kernel: tpu_custom_call.1
= control target key start
LH: loop header
LB: loop body
LE: loop exit
PB: predicated region body
PF: predicated region fallthrough
CT: control target
= control target key end

     0   :  { %s934_s0 = inlined_call_operand.vmem [shape: s32[4], index: 0, kind: input, shape index: {}]   ;;  %s935_s1 = inlined_call_operand.vmem [shape: bf16[16,32], index: 1, kind: input, shape index: {}]   ;;  %s936_s2 = inlined_call_operand.vmem [shape: bf16[4,32,64], index: 2, kind: input, shape index: {}]   ;;  %s937_s3 = inlined_call_operand.vmem [shape: f32[4,1,64], index: 3, kind: input, shape index: {}]   ;;  %s938_s4 = inlined_call_operand.vmem [shape: bf16[4,64,32], index: 4, kind: input, shape index: {}]   ;;  %s939_s5 = inlined_call_operand.vmem [shape: f32[4,1,32], index: 5, kind: input, shape index: {}]   ;;  %s940_s6 = inlined_call_operand.vmem [shape: f32[4,16], index: 6, kind: input, shape index: {}]   ;;  %s941_s7 = inlined_call_operand.hbm [shape: f32[16,32], index: 7, kind: output, shape index: {}]  }
   0x1   :  { %s12_s26 = sshll.u32 %s934_s0, 4  ;;  %s13_s26 = int_to_ptr.vmem [resolvable:$true] %s12_s26 }
   0x2   :  { %s729_s27 = scalar_lea.vmem %s13_s26, 16  ;;  %p734_p1 = scmp.lt.s32.totalorder %s13_s26, %s13_s26 }
   0x3   :  { %p730_p0 = scmp.ne.s32.totalorder %s13_s26, %s729_s27  ;;  %p735_p2 = scmp.lt.s32.totalorder %s729_s27, %s729_s27 }
   0x5   :  { %p736_p3 = por %p735_p2, %p734_p1 }
   0x7   :  { %p737_p4 = pnand %p736_p3, %p730_p0 }
   0x9   :  { %740 = shalt.err (!%p737_p4)  }
   0xa   :  { %s797_s28 = smov [#allocation3]  }
   0xb   :  { %15 = dma.vmem_to_smem %s13_s26, 16, %s797_s28, [#allocation2] }
   0xc   :  { %779 = dma.done.wait [#allocation2], 16 }
   0xd   :  { %780 = vsyncadd [#allocation2], 4294967280 }
   0xe   :  { %17 = sfence }
   0xf   :  { %18 = vsyncpa [#allocation5], 0  ;;  %s848_s29 = smov 0   ;;  %s850_s30 = smov 0  }
  0x10   :  { %s852_s8 = smov 0  }
  0x11 LB: > { %s622_s0 = sadd.s32 4294967295, %s795_s8   ;;  %s33_s9 = sadd.s32 1, %s791_s30  ;;  %s795_s8 = sphi %s852_s8, %s24_s8   ;;  %s791_s30 = sphi %s850_s30, %s944_s30   ;;  %s787_s29 = sphi %s848_s29, %s943_s29  }
  0x12   : > { %p34_p5 = scmp.ge.s32.totalorder %s33_s9, 4  ;;  %p626_p6 = scmp.ge.s32.totalorder %s795_s8, 1 }
  0x13   : > { %p242_p7 = scmp.lt.s32.totalorder %s795_s8, 5 }
  0x14   : > { %s946_s9 = smov (%p34_p5, %s33_s9), 0 }
  0x15   : > { %p243_p8 = pnand %p626_p6, %p242_p7 }
  0x16   : > { %p627_p9 = scmp.ne.s32.totalorder (!%p243_p8), %s787_s29, 0 }
  0x17   : > { %246 = sbr.rel (%p243_p8) target bundleno = 544 (0x220), region = 44 }
  0x1e   : > { %286 = sbr.rel (%p627_p9) target bundleno = 37 (0x25), region = 48  ;;  %vm287_vm0 = vcmask (!%p627_p9), 261120   ;;  %v798_v0 = vmov (!%p627_p9), 0.0  }
  0x1f   : > { %288 = vst.msk [vmem:[#allocation4] sm:$0xff] (!%p627_p9), %vm287_vm0, %v798_v0  ;;  %289 = vst.msk [vmem:[#allocation4 + $0x8] sm:$0xff] (!%p627_p9), %vm287_vm0, %v798_v0 }
  0x25 PF: > { %s292_s10 = sld [smem:[#allocation3 + %s787_s29]] }
  0x2b   : > { %p628_p10 = scmp.le.s32.totalorder %s292_s10, 0 }
  0x2c   : > { %s648_s11 = sshll.u32 (!%p628_p10), %s787_s29, 4  ;;  %s483_s14 = scalar_lea.vmem (!%p628_p10), %s940_s6, %s787_s29  ;;  %v799_v1 = vmov (!%p628_p10), 0.0   ;;  %vm800_vm1 = vmmov (!%p628_p10), 0   ;;  %v720_v5 = vld [vmem:[%s935_s1] sm:$0xff] (!%p628_p10)   ;;  %vm344_vm2 = vcmask (!%p628_p10), 261120   ;;  %v801_v10 = vmov (!%p628_p10), 0  }
  0x2d   : > { %296 = sbr.rel (%p628_p10) target bundleno = 518 (0x206), region = 52  ;;  %658 = vmatprep.subr.bf16.mxu0 (!%p628_p10), %v799_v1  ;;  %s299_s17 = scalar_lea.vmem (!%p628_p10), %s936_s2, %s648_s11  ;;  %662 = vmatprep.mubr.msk.bf16.mxu0 (!%p628_p10), %vm800_vm1, %v799_v1  ;;  %v484_v2 = vld [vmem:[%s483_s14] sm:$0x1] (!%p628_p10)  ;;  %vm438_vm3 = vcmask (!%p628_p10), 523264   ;;  %v518_v50 = vld [vmem:[#allocation4 + $0x8] sm:$0xff] (!%p628_p10) }
  0x2e   : > { %v718_v3 = vld [vmem:[%s299_s17] sm:$0xff] (!%p628_p10)   ;;  %485 = vxpose.xlu0.b32.start.end [1/1] (short) (narrow) (!%p628_p10), %v484_v2, 16  ;;  %666 = vmatprep.subr.bf16.mxu1 (!%p628_p10), %v799_v1  ;;  %v719_v4 = vld [vmem:[%s299_s17 + $0x8] sm:$0xff] (!%p628_p10)   ;;  %s649_s20 = sshll.u32 (!%p628_p10), %s787_s29, 5  ;;  %s304_s26 = scalar_lea.vmem (!%p628_p10), %s937_s3, %s787_s29 }
  0x2f   : > { %674 = vmatprep.mubr.msk.bf16.mxu1 (!%p628_p10), %vm800_vm1, %v799_v1  ;;  %659 = vmatpush3.bf16.msra.mxu0 (!%p628_p10), %v718_v3  ;;  %s308_s23 = scalar_lea.vmem (!%p628_p10), %s938_s4, %s649_s20  ;;  %v633_v13 = vld [vmem:[%s304_s26] ss:$0 sm:$0xff] (!%p628_p10)  ;;  %s317_s10 = scalar_lea.vmem (!%p628_p10), %s939_s5, %s787_s29 }
  0x30   : > { %660 = vmatprep.subr.bf16.mxu0 (!%p628_p10), %v799_v1  ;;  %v721_v6 = vld [vmem:[%s308_s23] sm:$0xff] (!%p628_p10)   ;;  %v722_v7 = vld [vmem:[%s308_s23 + $0x8] sm:$0xff] (!%p628_p10)   ;;  %v723_v8 = vld [vmem:[%s308_s23 + $0x10] sm:$0xff] (!%p628_p10)   ;;  %717 = vset.pattern.permute.xlu1 (!%p628_p10), %v801_v10 }
  0x31   : > { %667 = vmatpush3.bf16.msra.mxu1 (!%p628_p10), %v721_v6  ;;  %v724_v9 = vld [vmem:[%s308_s23 + $0x18] sm:$0xff] (!%p628_p10)   ;;  %v638_v39 = vld [vmem:[%s317_s10] ss:$0 sm:$0xff] (!%p628_p10) }
  0x32   : > { %668 = vmatprep.subr.bf16.mxu1 (!%p628_p10), %v799_v1  ;;  %v517_v44 = vld [vmem:[#allocation4] sm:$0xff] (!%p628_p10) }
  0x33   : > { %661 = vmatpush3.bf16.msra.mxu0 (!%p628_p10), %v719_v4 }
  0x35   : > { %669 = vmatpush3.bf16.msra.mxu1 %v722_v7 }
  0x36   : > { %663 = vmatmul.mubr.msk.bf16.vlgmr.msra.gmra.mrb[0].mxu0 %vm344_vm2, %v720_v5  ;;  %670 = vmatprep.subr.bf16.mxu1 %v799_v1 }
  0x39   : > { %671 = vmatpush3.bf16.msra.mxu1 %v723_v8 }
  0x3a   : > { %672 = vmatprep.subr.bf16.mxu1 %v799_v1 }
  0x3d   : > { %673 = vmatpush3.bf16.msra.mxu1 %v724_v9 }
  0x57   : > { %716 = vset.pattern.permute.xlu0 %v801_v10 }
  0xae   : > { %v501_v11 = vpop.trf.xlu0 }
  0xaf   : > { %521 = vperm.xlu0 %716, %v501_v11  }
  0xb2   : > { %v502_v12 = vpop.trf.xlu0 }
  0xb3   : > { %526 = vperm.xlu1 %717, %v502_v12  }
 0x109   : > { %v382_v14 = vpop.f32.mrb[0].mxu0 }
 0x10a   : > { %v383_v15 = vadd.f32 %v633_v13, %v382_v14  ;;  %v664_v16 = vpop.f32.mrb[1].mxu0 }
 0x10b   : > { %v385_v17 = vpop.f32.mrb[2].mxu0 }
 0x10c   : > { %v391_v18 = vmul.f32 0.044715, %v383_v15  ;;  %v386_v19 = vadd.f32 %v633_v13, %v385_v17  ;;  %v665_v20 = vpop.f32.mrb[3].mxu0  ;;  %v389_v33 = vmul.f32 0.5, %v383_v15 }
 0x10e   : > { %v393_v21 = vmul.f32 %v391_v18, %v383_v15  ;;  %v392_v22 = vmul.f32 0.044715, %v386_v19  ;;  %v390_v34 = vmul.f32 0.5, %v386_v19 }
 0x110   : > { %v395_v23 = vmul.f32 %v393_v21, %v383_v15  ;;  %v394_v24 = vmul.f32 %v392_v22, %v386_v19 }
 0x112   : > { %v397_v25 = vadd.f32 %v395_v23, %v383_v15  ;;  %v396_v26 = vmul.f32 %v394_v24, %v386_v19 }
 0x114   : > { %v399_v27 = vmul.f32 0.7978846, %v397_v25  ;;  %v398_v28 = vadd.f32 %v396_v26, %v386_v19 }
 0x116   : > { %725 = vtanh.f32 %v399_v27  ;;  %v400_v29 = vmul.f32 0.7978846, %v398_v28 }
 0x118   : > { %727 = vtanh.f32 %v400_v29 }
 0x120   : > { %v726_v30 = vpop.eup %725 }
 0x121   : > { %v403_v31 = vadd.f32 1.0, %v726_v30 }
 0x122   : > { %v728_v32 = vpop.eup %727 }
 0x123   : > { %v404_v35 = vadd.f32 1.0, %v728_v32  ;;  %v405_v36 = vmul.f32 %v403_v31, %v389_v33 }
 0x125   : > { %v406_v37 = vmul.f32 %v404_v35, %v390_v34 }
 0x127   : > { %v407_v38 = vpack.c.bf16 %v406_v37, %v405_v36 }
 0x129   : > { %675 = vmatmul.mubr.msk.bf16.vlgmr.msra.gmra.mrb[0].mxu1 %vm438_vm3, %v407_v38 }
 0x12e   : > { %v522_v41 = vpop.permute.xlu0 %521 }
 0x132   : > { %v527_v46 = vpop.permute.xlu1 %526 }
 0x1fc   : > { %v476_v40 = vpop.f32.mrb[0].mxu1 }
 0x1fd   : > { %v477_v42 = vadd.f32 %v638_v39, %v476_v40  ;;  %v676_v43 = vpop.f32.mrb[1].mxu1 }
 0x1fe   : > { %v479_v45 = vpop.f32.mrb[2].mxu1 }
 0x1ff   : > { %v529_v47 = vmul.f32 %v522_v41, %v477_v42  ;;  %v480_v48 = vadd.f32 %v638_v39, %v479_v45  ;;  %v677_v49 = vpop.f32.mrb[3].mxu1 }
 0x201   : > { %v531_v51 = vadd.f32 %v529_v47, %v517_v44  ;;  %v530_v52 = vmul.f32 %v527_v46, %v480_v48 }
 0x203   : > { %533 = vst.msk [vmem:[#allocation4] sm:$0xff] %vm344_vm2, %v531_v51  ;;  %v532_v53 = vadd.f32 %v530_v52, %v518_v50 }
 0x205   : > { %534 = vst.msk [vmem:[#allocation4 + $0x8] sm:$0xff] %vm344_vm2, %v532_v53 }
 0x206 PF: > { %p899_p11 = scmp.eq.s32.totalorder %s622_s0, 3  ;;  %s802_s11 = smov [#allocation4]  }
 0x207   : > { %s544_s12 = sshll.u32 %s802_s11, 4  ;;  %s545_s12 = int_to_ptr.vmem [resolvable:$true] %s544_s12 }
 0x208   : > { %s741_s13 = scalar_lea.vmem %s545_s12, 256  ;;  %p748_p1 = scmp.lt.s32.totalorder %s545_s12, %s545_s12 }
 0x209   : > { %p742_p12 = scmp.ne.s32.totalorder %s545_s12, %s741_s13  ;;  %p749_p2 = scmp.lt.s32.totalorder %s741_s13, %s741_s13 }
 0x20b   : > { %p743_p13 = pnand %p742_p12, %p899_p11  ;;  %p750_p3 = por %p749_p2, %p748_p1 }
 0x20d   : > { %p744_p0 = pneg %p743_p13 }
 0x20f   : > { %p751_p4 = pnand %p750_p3, %p744_p0 }
 0x211   : > { %754 = shalt.err (!%p751_p4)
}
 0x212   : > { %s755_s0 = scalar_lea.hbm %s941_s7, 256 }
 0x213   : > { %p756_p5 = scmp.ne.s32.totalorder %s941_s7, %s755_s0  ;;  %p761_p8 = scmp.lt.u32.totalorder %s755_s0, %s941_s7 }
 0x215   : > { %p757_p6 = pnand %p756_p5, %p899_p11 }
 0x217   : > { %p758_p7 = pneg %p757_p6 }
 0x219   : > { %p763_p9 = pnand %p761_p8, %p758_p7 }
 0x21b   : > { %766 = shalt.err (!%p763_p9)
}
 0x21c   : > { %s803_s20 = smov 128   ;;  %s804_s21 = smov 8  }
 0x21d   : > { %679 = dma.vmem_to_hbm [thread:$0]  (%p899_p11), %s545_s12, 256, %s941_s7, [#allocation5], %s803_s20, %s803_s20, %s804_s21  }
 0x21e   : > { %782 = dma.done.wait (%p899_p11), [#allocation5], 256  }
 0x21f   : > { %784 = vsyncadd (%p899_p11), [#allocation5], 4294967040 }
 0x220 PF: > { %s24_s8 = sadd.s32 1, %s795_s8   ;;  %s943_s29 = smov %s791_s30 }
 0x221   : > { %p21_p10 = scmp.ge.s32.totalorder %s24_s8, 6   ;;  %s944_s30 = smov %s946_s9 }
 0x223   :  { %23 = sbr.rel (!%p21_p10) target bundleno = 17 (0x11), region = 88 }
 0x22a   :  { %560 = vsyncpa [#allocation5], 1 }
 0x22b   :  { %562 = vsyncpa [#allocation5 + $0x1], 1 }

</bundles_post_ra>
